<compile_context>
chip_gen: v5e
topology: v5e:2x2
jax: 0.10.0
libtpu: 0.0.40
codegen_flags: <defaults>
</compile_context>

<pallas_src>
import functools

import numpy as np
import jax
import jax.numpy as jnp
from jax.experimental import pallas as pl
from jax.experimental.pallas import tpu as pltpu


def _round_up(x, m):
    return (x + m - 1) // m * m


# --------------------------------------------------------------------------
# Grouped-expert kernel.
# Grid = (num_row_tiles, num_hidden_chunks).  Each row tile belongs to exactly
# one expert (rows were sorted & per-expert padded in the wrapper); the expert
# id comes from the scalar-prefetched tile_expert array and drives the weight
# index_maps.  The inner axis tiles the hidden dim H; partial y contributions
# accumulate into a resident f32 scratch and are written (gated) at the last
# chunk.  Invalid (slack) tiles skip all compute and store zeros.
# --------------------------------------------------------------------------
def _moe_group_kernel(te_ref, tv_ref, x_ref, w1_ref, b1_ref, w2_ref, b2_ref,
                      g_ref, o_ref, acc_ref):
    t = pl.program_id(0)
    hi = pl.program_id(1)
    last = hi == pl.num_programs(1) - 1
    valid = tv_ref[t] != 0

    @pl.when(valid & (hi == 0))
    def _init():
        acc_ref[...] = jnp.zeros_like(acc_ref)

    @pl.when(valid)
    def _ffn_chunk():
        # ReLU(x @ W1[:, chunk] + b1[chunk]) @ W2[chunk, :]  (exact: ReLU is
        # elementwise in H), bf16 MXU operands, f32 accumulation.
        h = jnp.dot(x_ref[...], w1_ref[0], preferred_element_type=jnp.float32)
        h = jnp.maximum(h + b1_ref[0], 0.0)
        # TODO(synk): nn.Dropout(p=0.5) between ReLU and Linear2 is train-only.
        acc_ref[...] += jnp.dot(h.astype(w2_ref.dtype), w2_ref[0],
                                preferred_element_type=jnp.float32)

    @pl.when(valid & last)
    def _store():
        o_ref[...] = ((acc_ref[...] + b2_ref[0]) * g_ref[...]).astype(o_ref.dtype)

    @pl.when(jnp.logical_not(valid) & last)
    def _store_zero():
        o_ref[...] = jnp.zeros_like(o_ref)


# --------------------------------------------------------------------------
# One-time parameter preparation (hoisted out of the per-call path): stack,
# transpose to (in, out) layout and cast MXU operands to bf16.
# --------------------------------------------------------------------------
def prepare_moe_params(params, compute_dtype=jnp.bfloat16):
    return {
        'w1': jnp.transpose(params['w1'], (0, 2, 1)).astype(compute_dtype),  # (E, D, H)
        'b1': params['b1'][:, None, :].astype(jnp.float32),                  # (E, 1, H)
        'w2': jnp.transpose(params['w2'], (0, 2, 1)).astype(compute_dtype),  # (E, H, D)
        'b2': params['b2'][:, None, :].astype(jnp.float32),                  # (E, 1, D)
        'wr': params['wr'].astype(jnp.float32),                              # (E, D)
        'br': params['br'].astype(jnp.float32),                              # (E,)
    }


def moe_pallas(x, kparams, k_top, *, row_tile=256, hidden_tile=1024,
               compute_dtype=jnp.bfloat16):
    """MoE forward (eval mode). x: (B, D) float32; kparams from prepare_moe_params."""
    B, D = x.shape
    E, Dw, H = kparams['w1'].shape
    assert D == Dw
    assert D % 128 == 0 and H % 128 == 0, "feature dims must be lane-dense (x128)"
    K = k_top

    # ---- routing: router linear + top-k + softmax (O(B*E), plain JAX glue).
    logits = x @ kparams['wr'].T + kparams['br']                  # (B, E) f32
    top_w, top_i = jax.lax.top_k(logits, K)
    top_w = jax.nn.softmax(top_w, axis=-1)

    # ---- expand to B*K (token, expert, gate) triples and sort by expert.
    expert_ids = top_i.reshape(-1).astype(jnp.int32)              # (B*K,)
    gates = top_w.reshape(-1)                                     # (B*K,)
    token_ids = jnp.repeat(jnp.arange(B, dtype=jnp.int32), K)     # (B*K,)

    order = jnp.argsort(expert_ids)
    e_sorted = expert_ids[order]
    tok_sorted = token_ids[order]
    gate_sorted = gates[order]

    # ---- per-expert groups, each padded to a multiple of the row tile so
    # every row tile belongs to exactly one expert.
    tb = min(row_tile, _round_up(B * K, 8))
    tb = _round_up(tb, 8)
    counts = jnp.bincount(e_sorted, length=E)                       # (E,)
    padded = ((counts + tb - 1) // tb) * tb                         # (E,)
    group_end = jnp.cumsum(padded).astype(jnp.int32)                # (E,)
    group_start = jnp.concatenate(
        [jnp.zeros((1,), jnp.int32), group_end])[:E]                # (E,)
    count_start = jnp.concatenate(
        [jnp.zeros((1,), counts.dtype), jnp.cumsum(counts)])[:E]    # (E,)

    rank = jnp.arange(B * K, dtype=jnp.int32) - count_start[e_sorted]
    dest = group_start[e_sorted] + rank                             # (B*K,)

    # Static upper bound on the number of row tiles (>= sum(padded)/tb).
    T = pl.cdiv(B * K, tb) + E
    Ntot = T * tb

    xg = jnp.zeros((Ntot, D), compute_dtype).at[dest].set(
        x[tok_sorted].astype(compute_dtype))                        # grouped rows (bf16)
    gw = jnp.zeros((Ntot, 1), jnp.float32).at[dest].set(gate_sorted[:, None])
    tok_all = jnp.zeros((Ntot,), jnp.int32).at[dest].set(tok_sorted)

    # Per-tile expert id + validity flag (scalar-prefetched into SMEM).
    tile_start = jnp.arange(T, dtype=jnp.int32) * tb
    tile_expert = jnp.searchsorted(group_end, tile_start, side='right')
    tile_expert = jnp.minimum(tile_expert, E - 1).astype(jnp.int32)
    tile_valid = (tile_start < group_end[E - 1]).astype(jnp.int32)

    # ---- hidden-dim tiling (bounds VMEM independently of H).
    tH = min(hidden_tile, H)
    assert H % tH == 0 and tH % 128 == 0
    n_h = H // tH

    # VMEM/step (double-buffered): w1+w2 chunks 2*2*(D*tH*2B) bf16, x/out/acc
    # row tiles ~ tb*D*(2+4+4)B.  Defaults (tb=256, tH=1024) stay far under
    # the 48 MiB limit below even at D=1024; 48 MiB leaves headroom on v7x's
    # 64 MiB physical VMEM (v5e/v6e have 128 MiB).
    grid = (T, n_h)
    out_expanded = pl.pallas_call(
        _moe_group_kernel,
        out_shape=jax.ShapeDtypeStruct((Ntot, D), jnp.float32),
        grid_spec=pltpu.PrefetchScalarGridSpec(
            num_scalar_prefetch=2,
            grid=grid,
            in_specs=[
                pl.BlockSpec((tb, D), lambda t, h, te, tv: (t, 0)),          # grouped x rows
                pl.BlockSpec((1, D, tH), lambda t, h, te, tv: (te[t], 0, h)),  # W1[e][:,chunk]
                pl.BlockSpec((1, 1, tH), lambda t, h, te, tv: (te[t], 0, h)),  # b1[e][chunk]
                pl.BlockSpec((1, tH, D), lambda t, h, te, tv: (te[t], h, 0)),  # W2[e][chunk,:]
                pl.BlockSpec((1, 1, D), lambda t, h, te, tv: (te[t], 0, 0)),   # b2[e]
                pl.BlockSpec((tb, 1), lambda t, h, te, tv: (t, 0)),            # gate per row
            ],
            out_specs=pl.BlockSpec((tb, D), lambda t, h, te, tv: (t, 0)),
            scratch_shapes=[pltpu.VMEM((tb, D), jnp.float32)],
        ),
        compiler_params=pltpu.CompilerParams(
            dimension_semantics=("parallel", "arbitrary"),
            vmem_limit_bytes=48 * 1024 * 1024,
        ),
    )(tile_expert, tile_valid, xg, kparams['w1'], kparams['b1'],
      kparams['w2'], kparams['b2'], gw)

    # ---- combine: scatter-add the gated per-(token,expert) outputs back to
    # tokens and add the residual (padding rows are exact zeros -> harmless).
    combined = jnp.zeros((B, D), jnp.float32).at[tok_all].add(out_expanded)
    return x + combined


# --------------------------------------------------------------------------
# Pure-JAX reference mirroring the PyTorch MoE.forward (eval mode), all f32.
# --------------------------------------------------------------------------
def moe_ref(x, params, k_top):
    logits = x @ params['wr'].T + params['br']
    top_w, top_i = jax.lax.top_k(logits, k_top)
    top_w = jax.nn.softmax(top_w, axis=-1)

    def expert(w1, b1, w2, b2):
        h = jax.nn.relu(x @ w1.T + b1)
        return h @ w2.T + b2                                  # Dropout = identity

    eo = jax.vmap(expert)(params['w1'], params['b1'],
                          params['w2'], params['b2'])         # (E, B, D)
    eo = jnp.transpose(eo, (1, 0, 2))                         # (B, E, D)
    sel = jnp.take_along_axis(eo, top_i[:, :, None], axis=1)  # (B, k, D)
    out = jnp.sum(sel * top_w[:, :, None], axis=1)
    return out + x


# --------------------------------------------------------------------------
if __name__ == "__main__":
    # Small shapes consistent with the module (num_experts=8, k_top=2 from the
    # config; input_dim / expert_units scaled down but kept lane-dense).
    B, D, E, H, K = 64, 128, 8, 256, 2

    key = jax.random.PRNGKey(0)
    ks = jax.random.split(key, 8)
    params = {
        'w1': jax.random.normal(ks[0], (E, H, D), jnp.float32) / np.sqrt(D),
        'b1': 0.1 * jax.random.normal(ks[1], (E, H), jnp.float32),
        'w2': jax.random.normal(ks[2], (E, D, H), jnp.float32) / np.sqrt(H),
        'b2': 0.1 * jax.random.normal(ks[3], (E, D), jnp.float32),
        'wr': jax.random.normal(ks[4], (E, D), jnp.float32) / np.sqrt(D),
        'br': 0.1 * jax.random.normal(ks[5], (E,), jnp.float32),
    }
    x = jax.random.normal(ks[6], (B, D), jnp.float32)

    # One-time, outside the jitted forward (review: hoist transpose + cast).
    kparams = prepare_moe_params(params)

    moe_fn = jax.jit(functools.partial(moe_pallas, k_top=K))
    out = jax.block_until_ready(moe_fn(x, kparams))

    ref = moe_ref(x, params, K)
    # bf16 MXU operands with f32 accumulation -> loose-ish tolerance.
    np.testing.assert_allclose(np.asarray(out), np.asarray(ref),
                               rtol=2e-2, atol=2e-2)
    print("KERNEL_OK")
</pallas_src>

<mosaic_0001>
module attributes {stable_mosaic.version = 11 : i64} {
  func.func @_moe_group_kernel(%arg0: i32, %arg1: i32, %arg2: memref<9xi32, #tpu.memory_space<smem>>, %arg3: memref<9xi32, #tpu.memory_space<smem>>, %arg4: memref<128x128xbf16, #tpu.memory_space<vmem>>, %arg5: memref<1x128x256xbf16, #tpu.memory_space<vmem>>, %arg6: memref<1x1x256xf32, #tpu.memory_space<vmem>>, %arg7: memref<1x256x128xbf16, #tpu.memory_space<vmem>>, %arg8: memref<1x1x128xf32, #tpu.memory_space<vmem>>, %arg9: memref<128x1xf32, #tpu.memory_space<vmem>>, %arg10: memref<128x128xf32, #tpu.memory_space<vmem>>, %arg11: memref<128x128xf32, #tpu.memory_space<vmem>>) attributes {dimension_semantics = [#tpu.dimension_semantics<parallel>, #tpu.dimension_semantics<arbitrary>], iteration_bounds = array<i64: 9, 1>, scalar_prefetch = 2 : i64, scratch_operands = 1 : i64, tpu.core_type = #tpu.core_type<tc>, window_params = [{transform_indices = @transform_0, window_bounds = array<i64: 128, 128>}, {transform_indices = @transform_1, window_bounds = array<i64: 1, 128, 256>}, {transform_indices = @transform_2, window_bounds = array<i64: 1, 1, 256>}, {transform_indices = @transform_3, window_bounds = array<i64: 1, 256, 128>}, {transform_indices = @transform_4, window_bounds = array<i64: 1, 1, 128>}, {transform_indices = @transform_5, window_bounds = array<i64: 128, 1>}, {transform_indices = @transform_6, window_bounds = array<i64: 128, 128>}]} {
    %c0_i32 = arith.constant 0 : i32
    %0 = arith.cmpi eq, %arg1, %c0_i32 : i32
    %1 = arith.index_cast %arg0 : i32 to index
    %2 = memref.load %arg3[%1] : memref<9xi32, #tpu.memory_space<smem>>
    %c0_i32_0 = arith.constant 0 : i32
    %3 = arith.cmpi ne, %2, %c0_i32_0 : i32
    %c0_i32_1 = arith.constant 0 : i32
    %4 = arith.cmpi eq, %arg1, %c0_i32_1 : i32
    %5 = arith.andi %3, %4 : i1
    %6 = arith.extui %5 : i1 to i32
    %c0_i32_2 = arith.constant 0 : i32
    %7 = arith.cmpi ne, %6, %c0_i32_2 : i32
    scf.if %7 {
      %cst = arith.constant 0.000000e+00 : f32
      %17 = vector.broadcast %cst : f32 to vector<128x128xf32>
      %c0 = arith.constant 0 : index
      %c0_6 = arith.constant 0 : index
      %18 = vector.load %arg11[%c0, %c0_6] : memref<128x128xf32, #tpu.memory_space<vmem>>, vector<128x128xf32>
      tpu.vector_store %arg11[%c0, %c0_6], %17 {strides = array<i32>} : memref<128x128xf32, #tpu.memory_space<vmem>>, vector<128x128xf32>,
    } else {
    }
    %8 = arith.extui %3 : i1 to i32
    %c0_i32_3 = arith.constant 0 : i32
    %9 = arith.cmpi ne, %8, %c0_i32_3 : i32
    scf.if %9 {
      %c0 = arith.constant 0 : index
      %c0_6 = arith.constant 0 : index
      %17 = vector.load %arg4[%c0, %c0_6] : memref<128x128xbf16, #tpu.memory_space<vmem>>, vector<128x128xbf16>
      %c0_7 = arith.constant 0 : index
      %c0_8 = arith.constant 0 : index
      %c0_9 = arith.constant 0 : index
      %18 = vector.load %arg5[%c0_7, %c0_8, %c0_9] : memref<1x128x256xbf16, #tpu.memory_space<vmem>>, vector<1x128x256xbf16>
      %19 = vector.shape_cast %18 : vector<1x128x256xbf16> to vector<128x256xbf16>
      %cst = arith.constant dense<0.000000e+00> : vector<128x256xf32>
      %20 = tpu.matmul %17, %19, %cst {dimension_numbers = #tpu.dot_dimension_numbers<[1], [0], [0], [1], [0, 0, 1, 1], [], []>} : vector<128x128xbf16>, vector<128x256xbf16>, vector<128x256xf32> -> vector<128x256xf32>
      %c0_10 = arith.constant 0 : index
      %c0_11 = arith.constant 0 : index
      %c0_12 = arith.constant 0 : index
      %21 = vector.load %arg6[%c0_10, %c0_11, %c0_12] : memref<1x1x256xf32, #tpu.memory_space<vmem>>, vector<1x1x256xf32>
      %22 = vector.shape_cast %21 : vector<1x1x256xf32> to vector<1x256xf32>
      %23 = vector.broadcast %22 : vector<1x256xf32> to vector<128x256xf32>
      %24 = arith.addf %20, %23 : vector<128x256xf32>
      %cst_13 = arith.constant 0.000000e+00 : f32
      %25 = vector.broadcast %cst_13 : f32 to vector<128x256xf32>
      %26 = arith.maximumf %24, %25 : vector<128x256xf32>
      %c0_14 = arith.constant 0 : index
      %c0_15 = arith.constant 0 : index
      %27 = vector.load %arg11[%c0_14, %c0_15] : memref<128x128xf32, #tpu.memory_space<vmem>>, vector<128x128xf32>
      %28 = arith.truncf %26 : vector<128x256xf32> to vector<128x256xbf16>
      %c0_16 = arith.constant 0 : index
      %c0_17 = arith.constant 0 : index
      %c0_18 = arith.constant 0 : index
      %29 = vector.load %arg7[%c0_16, %c0_17, %c0_18] : memref<1x256x128xbf16, #tpu.memory_space<vmem>>, vector<1x256x128xbf16>
      %30 = vector.shape_cast %29 : vector<1x256x128xbf16> to vector<256x128xbf16>
      %cst_19 = arith.constant dense<0.000000e+00> : vector<128x128xf32>
      %31 = tpu.matmul %28, %30, %cst_19 {dimension_numbers = #tpu.dot_dimension_numbers<[1], [0], [0], [1], [0, 0, 1, 1], [], []>} : vector<128x256xbf16>, vector<256x128xbf16>, vector<128x128xf32> -> vector<128x128xf32>
      %32 = arith.addf %27, %31 : vector<128x128xf32>
      %c0_20 = arith.constant 0 : index
      %c0_21 = arith.constant 0 : index
      %33 = vector.load %arg11[%c0_20, %c0_21] : memref<128x128xf32, #tpu.memory_space<vmem>>, vector<128x128xf32>
      tpu.vector_store %arg11[%c0_20, %c0_21], %32 {strides = array<i32>} : memref<128x128xf32, #tpu.memory_space<vmem>>, vector<128x128xf32>,
    } else {
    }
    %10 = arith.andi %3, %0 : i1
    %11 = arith.extui %10 : i1 to i32
    %c0_i32_4 = arith.constant 0 : i32
    %12 = arith.cmpi ne, %11, %c0_i32_4 : i32
    scf.if %12 {
      %c0 = arith.constant 0 : index
      %c0_6 = arith.constant 0 : index
      %17 = vector.load %arg11[%c0, %c0_6] : memref<128x128xf32, #tpu.memory_space<vmem>>, vector<128x128xf32>
      %c0_7 = arith.constant 0 : index
      %c0_8 = arith.constant 0 : index
      %c0_9 = arith.constant 0 : index
      %18 = vector.load %arg8[%c0_7, %c0_8, %c0_9] : memref<1x1x128xf32, #tpu.memory_space<vmem>>, vector<1x1x128xf32>
      %19 = vector.shape_cast %18 : vector<1x1x128xf32> to vector<1x128xf32>
      %20 = vector.broadcast %19 : vector<1x128xf32> to vector<128x128xf32>
      %21 = arith.addf %17, %20 : vector<128x128xf32>
      %c0_10 = arith.constant 0 : index
      %c0_11 = arith.constant 0 : index
      %22 = vector.load %arg9[%c0_10, %c0_11] : memref<128x1xf32, #tpu.memory_space<vmem>>, vector<128x1xf32>
      %23 = vector.broadcast %22 : vector<128x1xf32> to vector<128x128xf32>
      %24 = arith.mulf %21, %23 : vector<128x128xf32>
      %c0_12 = arith.constant 0 : index
      %c0_13 = arith.constant 0 : index
      %25 = vector.load %arg10[%c0_12, %c0_13] : memref<128x128xf32, #tpu.memory_space<vmem>>, vector<128x128xf32>
      tpu.vector_store %arg10[%c0_12, %c0_13], %24 {strides = array<i32>} : memref<128x128xf32, #tpu.memory_space<vmem>>, vector<128x128xf32>,
    } else {
    }
    %true = arith.constant true
    %13 = arith.xori %3, %true : i1
    %14 = arith.andi %13, %0 : i1
    %15 = arith.extui %14 : i1 to i32
    %c0_i32_5 = arith.constant 0 : i32
    %16 = arith.cmpi ne, %15, %c0_i32_5 : i32
    scf.if %16 {
      %cst = arith.constant 0.000000e+00 : f32
      %17 = vector.broadcast %cst : f32 to vector<128x128xf32>
      %c0 = arith.constant 0 : index
      %c0_6 = arith.constant 0 : index
      %18 = vector.load %arg10[%c0, %c0_6] : memref<128x128xf32, #tpu.memory_space<vmem>>, vector<128x128xf32>
      tpu.vector_store %arg10[%c0, %c0_6], %17 {strides = array<i32>} : memref<128x128xf32, #tpu.memory_space<vmem>>, vector<128x128xf32>,
    } else {
    }
    return
  }
  func.func @transform_0(%arg0: i32, %arg1: i32, %arg2: memref<9xi32, #tpu.memory_space<smem>>, %arg3: memref<9xi32, #tpu.memory_space<smem>>) -> (i32, i32) {
    %c0_i32 = arith.constant 0 : i32
    %c0_i32_0 = arith.constant 0 : i32
    return %arg0, %c0_i32 : i32, i32
  }
  func.func @transform_1(%arg0: i32, %arg1: i32, %arg2: memref<9xi32, #tpu.memory_space<smem>>, %arg3: memref<9xi32, #tpu.memory_space<smem>>) -> (i32, i32, i32) {
    %0 = arith.index_cast %arg0 : i32 to index
    %1 = memref.load %arg2[%0] : memref<9xi32, #tpu.memory_space<smem>>
    %c0_i32 = arith.constant 0 : i32
    %c0_i32_0 = arith.constant 0 : i32
    return %1, %c0_i32, %arg1 : i32, i32, i32
  }
  func.func @transform_2(%arg0: i32, %arg1: i32, %arg2: memref<9xi32, #tpu.memory_space<smem>>, %arg3: memref<9xi32, #tpu.memory_space<smem>>) -> (i32, i32, i32) {
    %0 = arith.index_cast %arg0 : i32 to index
    %1 = memref.load %arg2[%0] : memref<9xi32, #tpu.memory_space<smem>>
    %c0_i32 = arith.constant 0 : i32
    %c0_i32_0 = arith.constant 0 : i32
    return %1, %c0_i32, %arg1 : i32, i32, i32
  }
  func.func @transform_3(%arg0: i32, %arg1: i32, %arg2: memref<9xi32, #tpu.memory_space<smem>>, %arg3: memref<9xi32, #tpu.memory_space<smem>>) -> (i32, i32, i32) {
    %0 = arith.index_cast %arg0 : i32 to index
    %1 = memref.load %arg2[%0] : memref<9xi32, #tpu.memory_space<smem>>
    %c0_i32 = arith.constant 0 : i32
    %c0_i32_0 = arith.constant 0 : i32
    return %1, %arg1, %c0_i32 : i32, i32, i32
  }
  func.func @transform_4(%arg0: i32, %arg1: i32, %arg2: memref<9xi32, #tpu.memory_space<smem>>, %arg3: memref<9xi32, #tpu.memory_space<smem>>) -> (i32, i32, i32) {
    %0 = arith.index_cast %arg0 : i32 to index
    %1 = memref.load %arg2[%0] : memref<9xi32, #tpu.memory_space<smem>>
    %c0_i32 = arith.constant 0 : i32
    %c0_i32_0 = arith.constant 0 : i32
    %c0_i32_1 = arith.constant 0 : i32
    return %1, %c0_i32, %c0_i32_0 : i32, i32, i32
  }
  func.func @transform_5(%arg0: i32, %arg1: i32, %arg2: memref<9xi32, #tpu.memory_space<smem>>, %arg3: memref<9xi32, #tpu.memory_space<smem>>) -> (i32, i32) {
    %c0_i32 = arith.constant 0 : i32
    %c0_i32_0 = arith.constant 0 : i32
    return %arg0, %c0_i32 : i32, i32
  }
  func.func @transform_6(%arg0: i32, %arg1: i32, %arg2: memref<9xi32, #tpu.memory_space<smem>>, %arg3: memref<9xi32, #tpu.memory_space<smem>>) -> (i32, i32) {
    %c0_i32 = arith.constant 0 : i32
    %c0_i32_0 = arith.constant 0 : i32
    return %arg0, %c0_i32 : i32, i32
  }
}

</mosaic_0001>

<bundles_post_ra>
// kernel: custom-call
= control target key start
LH: loop header
LB: loop body
LE: loop exit
PB: predicated region body
PF: predicated region fallthrough
CT: control target
= control target key end

     0   :  { %s6_s0 = inlined_call_operand.vmem [shape: u32[9], index: 0, kind: output, shape index: {}]  }

// kernel: moe_pallas.1
= control target key start
LH: loop header
LB: loop body
LE: loop exit
PB: predicated region body
PF: predicated region fallthrough
CT: control target
= control target key end

     0   :  { %s1695_s11 = smov [#allocation4]   ;;  %s1696_s12 = smov [#allocation5]   ;;  %s1998_s0 = inlined_call_operand.vmem [shape: s32[9], index: 0, kind: input, shape index: {}]   ;;  %s1999_s2 = inlined_call_operand.vmem [shape: bf16[1152,128], index: 2, kind: input, shape index: {}]   ;;  %s2000_s3 = inlined_call_operand.vmem [shape: bf16[8,128,256], index: 3, kind: input, shape index: {}]   ;;  %s2001_s4 = inlined_call_operand.vmem [shape: f32[8,1,256], index: 4, kind: input, shape index: {}]   ;;  %s2002_s5 = inlined_call_operand.vmem [shape: bf16[8,256,128], index: 5, kind: input, shape index: {}]   ;;  %s2003_s6 = inlined_call_operand.vmem [shape: f32[8,1,128], index: 6, kind: input, shape index: {}]   ;;  %s2004_s7 = inlined_call_operand.vmem [shape: f32[1152,1], index: 7, kind: input, shape index: {}]   ;;  %s2005_s8 = inlined_call_operand.vmem [shape: f32[1152,128], index: 8, kind: output, shape index: {}]   ;;  %s2006_s1 = inlined_call_operand.vmem [shape: s32[9], index: 1, kind: input, shape index: {}]  }
   0x1   :  { %s14_s29 = sshll.u32 %s1998_s0, 4  ;;  %s19_s10 = sshll.u32 %s2006_s1, 4  ;;  %s15_s29 = int_to_ptr.vmem [resolvable:$true] %s14_s29  ;;  %s20_s10 = int_to_ptr.vmem [resolvable:$true] %s19_s10 }
   0x2   :  { %17 = dma.vmem_to_smem %s15_s29, 16, %s1695_s11, [#allocation3] }
   0x3   :  { %22 = dma.vmem_to_smem %s20_s10, 16, %s1696_s12, [#allocation3] }
   0x4   :  { %1681 = dma.done.wait [#allocation3], 32 }
   0x5   :  { %1682 = vsyncadd [#allocation3], 4294967264 }
   0x6   :  { %25 = sfence }
   0x7   :  { %s1751_s13 = smov 0   ;;  %s1753_s14 = smov 0  }
   0x8   :  { %s1755_s15 = smov 0  }
   0x9 LB: > { %s43_s0 = sadd.s32 1, %s1689_s14  ;;  %p1391_p0 = scmp.ge.s32.totalorder %s1693_s15, 1  ;;  %s1693_s15 = sphi %s1755_s15, %s31_s15   ;;  %s1689_s14 = sphi %s1753_s14, %s2008_s14   ;;  %s1685_s13 = sphi %s1751_s13, %s2007_s13  }
   0xa   : > { %p45_p1 = scmp.ge.s32.totalorder %s43_s0, 9  ;;  %p325_p2 = scmp.lt.s32.totalorder %s1693_s15, 10 }
   0xc   : > { %s2010_s0 = smov (%p45_p1, %s43_s0), 0  ;;  %p326_p3 = pnand %p1391_p0, %p325_p2 }
   0xd   : > { %s1392_s1 = sshll.u32 (!%p326_p3), %s1685_s13, 4  ;;  %s399_s16 = sld [smem:[#allocation4 + %s1685_s13]] (!%p326_p3) }
   0xe   : > { %329 = sbr.rel (%p326_p3) target bundleno = 670 (0x29e), region = 44  ;;  %p394_p4 = scmp.lt.s32.totalorder (!%p326_p3), %s1392_s1, 143 }
   0xf   : > { %s411_s17 = sld [smem:[#allocation4 + %s1685_s13]] (!%p326_p3) }
  0x10   : > { %s422_s18 = sld [smem:[#allocation4 + %s1685_s13]] (!%p326_p3) }
  0x11   : > { %s434_s19 = sld [smem:[#allocation4 + %s1685_s13]] (!%p326_p3) }
  0x13   : > { %s2012_s1 = smov (!%p394_p4, %s1392_s1), 143  ;;  %p401_p5 = scmp.lt.s32.totalorder %s399_s16, 7 }
  0x14   : > { %s1393_s20 = sshll.u32 %s2012_s1, 2  ;;  %s1400_s21 = sshll.u32 %s2012_s1, 3 }
  0x15   : > { %s1779_s24 = scalar_lea.vmem %s1999_s2, %s1393_s20  ;;  %p413_p6 = scmp.lt.s32.totalorder %s411_s17, 7 }
  0x16   : > { %s1784_s27 = scalar_lea.vmem %s2004_s7, %s1400_s21  ;;  %s2014_s16 = smov (!%p401_p5, %s399_s16), 7 }
  0x17   : > { %s2016_s17 = smov (!%p413_p6, %s411_s17), 7  ;;  %s1568_s28 = sshll.u32 %s2014_s16, 7 }
  0x18   : > { %p424_p7 = scmp.lt.s32.totalorder %s422_s18, 7  ;;  %s1789_s9 = scalar_lea.vmem %s2000_s3, %s1568_s28 }
  0x19   : > { %s1396_s10 = sshll.u32 %s2016_s17, 1  ;;  %p435_p8 = scmp.lt.s32.totalorder %s434_s19, 7 }
  0x1a   : > { %s1794_s1 = scalar_lea.vmem %s2001_s4, %s1396_s10  ;;  %s2018_s18 = smov (!%p424_p7, %s422_s18), 7 }
  0x1b   : > { %s2020_s19 = smov (!%p435_p8, %s434_s19), 7  ;;  %s1569_s20 = sshll.u32 %s2018_s18, 7 }
  0x1c   : > { %s1801_s23 = scalar_lea.vmem %s2005_s8, %s1400_s21  ;;  %s1806_s17 = scalar_lea.vmem %s2002_s5, %s1569_s20 }
  0x1d   : > { %s437_s30 = scalar_lea.vmem %s2003_s6, %s2020_s19  ;;  %s1813_s10 = sld [smem:[#allocation5 + %s1685_s13]] }
  0x23   : > { %p453_p9 = scmp.ne.s32.totalorder %s1813_s10, 0 }
  0x24   : > { %v1697_v0 = vmov (%p453_p9), 0.0  }
  0x25   : > { %457 = sbr.rel (!%p453_p9) target bundleno = 53 (0x35), region = 48  ;;  %458 = vst [vmem:[#allocation2 + $0x30] sm:$0xff] (%p453_p9), %v1697_v0 }
  0x26   : > { %459 = vst [vmem:[#allocation2] sm:$0xff] (%p453_p9), %v1697_v0 }
  0x27   : > { %460 = vst [vmem:[#allocation2 + $0x58] sm:$0xff] (%p453_p9), %v1697_v0 }
  0x28   : > { %461 = vst [vmem:[#allocation2 + $0x18] sm:$0xff] (%p453_p9), %v1697_v0 }
  0x29   : > { %462 = vst [vmem:[#allocation2 + $0x50] sm:$0xff] (%p453_p9), %v1697_v0 }
  0x2a   : > { %463 = vst [vmem:[#allocation2 + $0x68] sm:$0xff] %v1697_v0 }
  0x2b   : > { %464 = vst [vmem:[#allocation2 + $0x8] sm:$0xff] %v1697_v0 }
  0x2c   : > { %465 = vst [vmem:[#allocation2 + $0x48] sm:$0xff] %v1697_v0 }
  0x2d   : > { %466 = vst [vmem:[#allocation2 + $0x40] sm:$0xff] %v1697_v0 }
  0x2e   : > { %467 = vst [vmem:[#allocation2 + $0x20] sm:$0xff] %v1697_v0 }
  0x2f   : > { %468 = vst [vmem:[#allocation2 + $0x10] sm:$0xff] %v1697_v0 }
  0x30   : > { %469 = vst [vmem:[#allocation2 + $0x38] sm:$0xff] %v1697_v0 }
  0x31   : > { %470 = vst [vmem:[#allocation2 + $0x60] sm:$0xff] %v1697_v0 }
  0x32   : > { %471 = vst [vmem:[#allocation2 + $0x70] sm:$0xff] %v1697_v0 }
  0x33   : > { %472 = vst [vmem:[#allocation2 + $0x78] sm:$0xff] %v1697_v0 }
  0x34   : > { %473 = vst [vmem:[#allocation2 + $0x28] sm:$0xff] %v1697_v0 }
  0x35 PF: > { %p1404_p10 = scmp.eq.s32.totalorder %s1813_s10, 0 }
  0x37   : > { %476 = sbr.rel (%p1404_p10) target bundleno = 492 (0x1ec), region = 52 }
  0x3c   : > { %v1495_v1 = vld [vmem:[%s1789_s9 + $0x70] sm:$0xf]  ;;  %v1594_v2 = vld [vmem:[%s1789_s9 + $0x74] sm:$0xf0]  ;;  %v1593_v3 = vld [vmem:[%s1789_s9 + $0x74] sm:$0xf] }
  0x3d   : > { %v1496_v4 = vor.u32 %v1594_v2, %v1495_v1  ;;  %v1497_v5 = vld [vmem:[%s1789_s9 + $0x78] sm:$0xf0]  ;;  %v1487_v6 = vld [vmem:[%s1789_s9 + $0x60] sm:$0xf]  ;;  %v1592_v7 = vld [vmem:[%s1789_s9 + $0x64] sm:$0xf0] }
  0x3e   : > { %v1500_v8 = vor.u32 %v1593_v3, %v1497_v5  ;;  %v1591_v9 = vld [vmem:[%s1789_s9 + $0x64] sm:$0xf]  ;;  %v1489_v10 = vld [vmem:[%s1789_s9 + $0x68] sm:$0xf0]  ;;  %v1488_v11 = vor.u32 %v1592_v7, %v1487_v6  ;;  %v1479_v13 = vld [vmem:[%s1789_s9 + $0x50] sm:$0xf] }
  0x3f   : > { %643 = vmatpush.bf16.msra.mxu0 %v1496_v4  ;;  %v1492_v12 = vor.u32 %v1591_v9, %v1489_v10  ;;  %v1590_v14 = vld [vmem:[%s1789_s9 + $0x54] sm:$0xf0]  ;;  %v1589_v15 = vld [vmem:[%s1789_s9 + $0x54] sm:$0xf]  ;;  %v1481_v16 = vld [vmem:[%s1789_s9 + $0x58] sm:$0xf0] }
  0x40   : > { %692 = vmatpush.bf16.msra.mxu1 %v1500_v8  ;;  %v1480_v17 = vor.u32 %v1590_v14, %v1479_v13  ;;  %v1484_v18 = vor.u32 %v1589_v15, %v1481_v16  ;;  %v1471_v19 = vld [vmem:[%s1789_s9 + $0x40] sm:$0xf]  ;;  %v1588_v20 = vld [vmem:[%s1789_s9 + $0x44] sm:$0xf0]  ;;  %v1587_v21 = vld [vmem:[%s1789_s9 + $0x44] sm:$0xf] }
  0x41   : > { %v1473_v22 = vld [vmem:[%s1789_s9 + $0x48] sm:$0xf0]  ;;  %v1472_v23 = vor.u32 %v1588_v20, %v1471_v19  ;;  %v1463_v25 = vld [vmem:[%s1789_s9 + $0x30] sm:$0xf]  ;;  %v1586_v26 = vld [vmem:[%s1789_s9 + $0x34] sm:$0xf0] }
  0x42   : > { %v1476_v24 = vor.u32 %v1587_v21, %v1473_v22  ;;  %v1585_v27 = vld [vmem:[%s1789_s9 + $0x34] sm:$0xf]  ;;  %v1465_v28 = vld [vmem:[%s1789_s9 + $0x38] sm:$0xf0]  ;;  %v1464_v29 = vor.u32 %v1586_v26, %v1463_v25  ;;  %v1455_v31 = vld [vmem:[%s1789_s9 + $0x20] sm:$0xf] }
  0x43   : > { %644 = vmatpush.bf16.msra.mxu0 %v1488_v11  ;;  %v1468_v30 = vor.u32 %v1585_v27, %v1465_v28  ;;  %v1584_v32 = vld [vmem:[%s1789_s9 + $0x24] sm:$0xf0]  ;;  %v1583_v33 = vld [vmem:[%s1789_s9 + $0x24] sm:$0xf]  ;;  %v1457_v34 = vld [vmem:[%s1789_s9 + $0x28] sm:$0xf0] }
  0x44   : > { %693 = vmatpush.bf16.msra.mxu1 %v1492_v12  ;;  %v1456_v35 = vor.u32 %v1584_v32, %v1455_v31  ;;  %v1460_v36 = vor.u32 %v1583_v33, %v1457_v34  ;;  %v1447_v37 = vld [vmem:[%s1789_s9 + $0x10] sm:$0xf]  ;;  %v1582_v38 = vld [vmem:[%s1789_s9 + $0x14] sm:$0xf0]  ;;  %v1581_v39 = vld [vmem:[%s1789_s9 + $0x14] sm:$0xf] }
  0x45   : > { %v1449_v40 = vld [vmem:[%s1789_s9 + $0x18] sm:$0xf0]  ;;  %v1448_v41 = vor.u32 %v1582_v38, %v1447_v37  ;;  %v1439_v43 = vld [vmem:[%s1789_s9] sm:$0xf]  ;;  %v1580_v44 = vld [vmem:[%s1789_s9 + $0x4] sm:$0xf0] }
  0x46   : > { %v1452_v42 = vor.u32 %v1581_v39, %v1449_v40  ;;  %v1579_v45 = vld [vmem:[%s1789_s9 + $0x4] sm:$0xf]  ;;  %v1441_v46 = vld [vmem:[%s1789_s9 + $0x8] sm:$0xf0]  ;;  %v1440_v47 = vor.u32 %v1580_v44, %v1439_v43  ;;  %v1573_v51 = vld [vmem:[%s1779_s24 + $0x10] sm:$0xff] }
  0x47   : > { %645 = vmatpush.bf16.msra.mxu0 %v1480_v17  ;;  %v1444_v48 = vor.u32 %v1579_v45, %v1441_v46  ;;  %v1571_v49 = vld [vmem:[%s1779_s24] sm:$0xff]  ;;  %v1572_v50 = vld [vmem:[%s1779_s24 + $0x8] sm:$0xff]  ;;  %v1574_v52 = vld [vmem:[%s1779_s24 + $0x18] sm:$0xff] }
  0x48   : > { %694 = vmatpush.bf16.msra.mxu1 %v1484_v18  ;;  %v1575_v53 = vld [vmem:[%s1779_s24 + $0x20] sm:$0xff]  ;;  %v1602_v54 = vld [vmem:[%s1806_s17 + $0x38] sm:$0xff]  ;;  %v1576_v56 = vld [vmem:[%s1779_s24 + $0x28] sm:$0xff] }
  0x49   : > { %v1610_v55 = vld [vmem:[%s1806_s17 + $0x78] sm:$0xff]  ;;  %933 = vmatpush.bf16.msra.mxu2 %v1602_v54  ;;  %v1601_v57 = vld [vmem:[%s1806_s17 + $0x30] sm:$0xff]  ;;  %v1600_v59 = vld [vmem:[%s1806_s17 + $0x28] sm:$0xff] }
  0x4a   : > { %982 = vmatpush.bf16.msra.mxu3 %v1610_v55  ;;  %v1609_v58 = vld [vmem:[%s1806_s17 + $0x70] sm:$0xff]  ;;  %v1608_v60 = vld [vmem:[%s1806_s17 + $0x68] sm:$0xff]  ;;  %v1599_v61 = vld [vmem:[%s1806_s17 + $0x20] sm:$0xff] }
  0x4b   : > { %646 = vmatpush.bf16.msra.mxu0 %v1472_v23  ;;  %v1607_v62 = vld [vmem:[%s1806_s17 + $0x60] sm:$0xff]  ;;  %v1577_v63 = vld [vmem:[%s1779_s24 + $0x30] sm:$0xff]  ;;  %v1598_v0 = vld [vmem:[%s1806_s17 + $0x18] sm:$0xff] }
  0x4c   : > { %695 = vmatpush.bf16.msra.mxu1 %v1476_v24  ;;  %v1606_v1 = vld [vmem:[%s1806_s17 + $0x58] sm:$0xff]  ;;  %v1597_v2 = vld [vmem:[%s1806_s17 + $0x10] sm:$0xff]  ;;  %v1596_v4 = vld [vmem:[%s1806_s17 + $0x8] sm:$0xff] }
  0x4d   : > { %934 = vmatpush.bf16.msra.mxu2 %v1601_v57  ;;  %v1605_v3 = vld [vmem:[%s1806_s17 + $0x50] sm:$0xff]  ;;  %v1604_v5 = vld [vmem:[%s1806_s17 + $0x48] sm:$0xff]  ;;  %v1595_v6 = vld [vmem:[%s1806_s17] sm:$0xff] }
  0x4e   : > { %983 = vmatpush.bf16.msra.mxu3 %v1609_v58  ;;  %v1603_v7 = vld [vmem:[%s1806_s17 + $0x40] sm:$0xff]  ;;  %v1578_v8 = vld [vmem:[%s1779_s24 + $0x38] sm:$0xff] }
  0x4f   : > { %647 = vmatpush.bf16.msra.mxu0 %v1464_v29  ;;  %v509_v9 = vld [vmem:[%s1794_s1] sm:$0x3] }
  0x50   : > { %696 = vmatpush.bf16.msra.mxu1 %v1468_v30  ;;  %v1878_v12 = vperm.slane %v509_v9, 0  ;;  %v1880_v13 = vperm.slane %v509_v9, 1 }
  0x51   : > { %935 = vmatpush.bf16.msra.mxu2 %v1600_v59 }
  0x52   : > { %984 = vmatpush.bf16.msra.mxu3 %v1608_v60 }
  0x53   : > { %648 = vmatpush.bf16.msra.mxu0 %v1456_v35 }
  0x54   : > { %697 = vmatpush.bf16.msra.mxu1 %v1460_v36 }
  0x55   : > { %936 = vmatpush.bf16.msra.mxu2 %v1599_v61 }
  0x56   : > { %985 = vmatpush.bf16.msra.mxu3 %v1607_v62 }
  0x57   : > { %649 = vmatpush.bf16.msra.mxu0 %v1448_v41 }
  0x58   : > { %698 = vmatpush.bf16.msra.mxu1 %v1452_v42 }
  0x59   : > { %937 = vmatpush.bf16.msra.mxu2 %v1598_v0 }
  0x5a   : > { %986 = vmatpush.bf16.msra.mxu3 %v1606_v1 }
  0x5b   : > { %650 = vmatpush.bf16.msra.mxu0 %v1440_v47 }
  0x5c   : > { %699 = vmatpush.bf16.msra.mxu1 %v1444_v48 }
  0x5d   : > { %938 = vmatpush.bf16.msra.mxu2 %v1597_v2 }
  0x5e   : > { %651 = vmatmul.bf16.vlgmr.msra.gmra.mxu0 %v1571_v49  ;;  %987 = vmatpush.bf16.msra.mxu3 %v1605_v3 }
  0x5f   : > { %700 = vmatmul.bf16.vlgmr.msra.gmra.mxu1 %v1571_v49 }
  0x61   : > { %939 = vmatpush.bf16.msra.mxu2 %v1596_v4 }
  0x62   : > { %988 = vmatpush.bf16.msra.mxu3 %v1604_v5 }
  0x65   : > { %940 = vmatpush.bf16.msra.mxu2 %v1595_v6 }
  0x66   : > { %989 = vmatpush.bf16.msra.mxu3 %v1603_v7 }
  0x6e   : > { %656 = vmatmul.bf16.gmra.mxu0 %v1572_v50 }
  0x6f   : > { %705 = vmatmul.bf16.gmra.mxu1 %v1572_v50 }
  0x7e   : > { %661 = vmatmul.bf16.gmra.mxu0 %v1573_v51 }
  0x7f   : > { %710 = vmatmul.bf16.gmra.mxu1 %v1573_v51 }
  0x8e   : > { %666 = vmatmul.bf16.gmra.mxu0 %v1574_v52 }
  0x8f   : > { %715 = vmatmul.bf16.gmra.mxu1 %v1574_v52 }
  0x9e   : > { %671 = vmatmul.bf16.gmra.mxu0 %v1575_v53 }
  0x9f   : > { %720 = vmatmul.bf16.gmra.mxu1 %v1575_v53 }
  0xae   : > { %676 = vmatmul.bf16.gmra.mxu0 %v1576_v56 }
  0xaf   : > { %725 = vmatmul.bf16.gmra.mxu1 %v1576_v56 }
  0xbe   : > { %681 = vmatmul.bf16.gmra.mxu0 %v1577_v63 }
  0xbf   : > { %730 = vmatmul.bf16.gmra.mxu1 %v1577_v63 }
  0xce   : > { %686 = vmatmul.bf16.gmra.mxu0 %v1578_v8 }
  0xcf   : > { %735 = vmatmul.bf16.gmra.mxu1 %v1578_v8 }
  0xdb   : > { %v652_v10 = vpop.f32.mrf.mxu0 }
  0xdc   : > { %v701_v11 = vpop.f32.mrf.mxu1  ;;  %v653_v14 = vadd.f32 %v652_v10, %v1878_v12 }
  0xdd   : > { %v702_v15 = vadd.f32 %v701_v11, %v1880_v13 }
  0xde   : > { %v741_v20 = vmax.f32 %v653_v14, 0.0 }
  0xdf   : > { %v742_v22 = vmax.f32 %v702_v15, 0.0 }
  0xe3   : > { %v654_v16 = vpop.f32.mrf.mxu0 }
  0xe4   : > { %v655_v17 = vadd.f32 %v654_v16, %v1878_v12  ;;  %v703_v18 = vpop.f32.mrf.mxu1 }
  0xe5   : > { %v704_v19 = vadd.f32 %v703_v18, %v1880_v13 }
  0xe6   : > { %v743_v21 = vmax.f32 %v655_v17, 0.0 }
  0xe7   : > { %v744_v23 = vmax.f32 %v704_v19, 0.0 }
  0xe8   : > { %v789_v24 = vpack.c.bf16 %v743_v21, %v741_v20 }
  0xe9   : > { %v790_v25 = vpack.c.bf16 %v744_v23, %v742_v22 }
  0xea   : > { %941 = vmatmul.bf16.vlgmr.msra.gmra.mxu2 %v789_v24 }
  0xeb   : > { %990 = vmatmul.bf16.vlgmr.msra.gmra.mxu3 %v790_v25  ;;  %v657_v26 = vpop.f32.mrf.mxu0 }
  0xec   : > { %v706_v27 = vpop.f32.mrf.mxu1  ;;  %v658_v28 = vadd.f32 %v657_v26, %v1878_v12 }
  0xed   : > { %v707_v29 = vadd.f32 %v706_v27, %v1880_v13 }
  0xee   : > { %v745_v34 = vmax.f32 %v658_v28, 0.0 }
  0xef   : > { %v746_v36 = vmax.f32 %v707_v29, 0.0 }
  0xf3   : > { %v659_v30 = vpop.f32.mrf.mxu0 }
  0xf4   : > { %v660_v31 = vadd.f32 %v659_v30, %v1878_v12  ;;  %v708_v32 = vpop.f32.mrf.mxu1 }
  0xf5   : > { %v709_v33 = vadd.f32 %v708_v32, %v1880_v13 }
  0xf6   : > { %v747_v35 = vmax.f32 %v660_v31, 0.0 }
  0xf7   : > { %v748_v37 = vmax.f32 %v709_v33, 0.0 }
  0xf8   : > { %v791_v38 = vpack.c.bf16 %v747_v35, %v745_v34 }
  0xf9   : > { %v792_v39 = vpack.c.bf16 %v748_v37, %v746_v36 }
  0xfa   : > { %946 = vmatmul.bf16.gmra.mxu2 %v791_v38 }
  0xfb   : > { %995 = vmatmul.bf16.gmra.mxu3 %v792_v39  ;;  %v662_v40 = vpop.f32.mrf.mxu0 }
  0xfc   : > { %v711_v41 = vpop.f32.mrf.mxu1  ;;  %v663_v42 = vadd.f32 %v662_v40, %v1878_v12 }
  0xfd   : > { %v712_v43 = vadd.f32 %v711_v41, %v1880_v13 }
  0xfe   : > { %v749_v48 = vmax.f32 %v663_v42, 0.0 }
  0xff   : > { %v750_v50 = vmax.f32 %v712_v43, 0.0 }
 0x103   : > { %v664_v44 = vpop.f32.mrf.mxu0 }
 0x104   : > { %v665_v45 = vadd.f32 %v664_v44, %v1878_v12  ;;  %v713_v46 = vpop.f32.mrf.mxu1 }
 0x105   : > { %v714_v47 = vadd.f32 %v713_v46, %v1880_v13 }
 0x106   : > { %v751_v49 = vmax.f32 %v665_v45, 0.0 }
 0x107   : > { %v752_v51 = vmax.f32 %v714_v47, 0.0 }
 0x108   : > { %v793_v52 = vpack.c.bf16 %v751_v49, %v749_v48 }
 0x109   : > { %v794_v53 = vpack.c.bf16 %v752_v51, %v750_v50 }
 0x10a   : > { %951 = vmatmul.bf16.gmra.mxu2 %v793_v52 }
 0x10b   : > { %1000 = vmatmul.bf16.gmra.mxu3 %v794_v53  ;;  %v667_v54 = vpop.f32.mrf.mxu0 }
 0x10c   : > { %v716_v55 = vpop.f32.mrf.mxu1  ;;  %v668_v56 = vadd.f32 %v667_v54, %v1878_v12 }
 0x10d   : > { %v717_v57 = vadd.f32 %v716_v55, %v1880_v13 }
 0x10e   : > { %v753_v62 = vmax.f32 %v668_v56, 0.0 }
 0x10f   : > { %v754_v0 = vmax.f32 %v717_v57, 0.0 }
 0x113   : > { %v669_v58 = vpop.f32.mrf.mxu0 }
 0x114   : > { %v670_v59 = vadd.f32 %v669_v58, %v1878_v12  ;;  %v718_v60 = vpop.f32.mrf.mxu1 }
 0x115   : > { %v719_v61 = vadd.f32 %v718_v60, %v1880_v13 }
 0x116   : > { %v755_v63 = vmax.f32 %v670_v59, 0.0 }
 0x117   : > { %v756_v1 = vmax.f32 %v719_v61, 0.0 }
 0x118   : > { %v795_v2 = vpack.c.bf16 %v755_v63, %v753_v62  ;;  %v773_v63 = vld [vmem:[#allocation2 + $0x30] sm:$0xff] }
 0x119   : > { %v796_v3 = vpack.c.bf16 %v756_v1, %v754_v0 }
 0x11a   : > { %956 = vmatmul.bf16.gmra.mxu2 %v795_v2 }
 0x11b   : > { %1005 = vmatmul.bf16.gmra.mxu3 %v796_v3  ;;  %v672_v4 = vpop.f32.mrf.mxu0 }
 0x11c   : > { %v721_v5 = vpop.f32.mrf.mxu1  ;;  %v673_v6 = vadd.f32 %v672_v4, %v1878_v12  ;;  %v774_v4 = vld [vmem:[#allocation2] sm:$0xff] }
 0x11d   : > { %v722_v7 = vadd.f32 %v721_v5, %v1880_v13 }
 0x11e   : > { %v757_v14 = vmax.f32 %v673_v6, 0.0 }
 0x11f   : > { %v758_v16 = vmax.f32 %v722_v7, 0.0  ;;  %v775_v7 = vld [vmem:[#allocation2 + $0x58] sm:$0xff] }
 0x123   : > { %v674_v8 = vpop.f32.mrf.mxu0 }
 0x124   : > { %v675_v9 = vadd.f32 %v674_v8, %v1878_v12  ;;  %v723_v10 = vpop.f32.mrf.mxu1 }
 0x125   : > { %v724_v11 = vadd.f32 %v723_v10, %v1880_v13 }
 0x126   : > { %v759_v15 = vmax.f32 %v675_v9, 0.0 }
 0x127   : > { %v760_v17 = vmax.f32 %v724_v11, 0.0 }
 0x128   : > { %v797_v18 = vpack.c.bf16 %v759_v15, %v757_v14  ;;  %v776_v14 = vld [vmem:[#allocation2 + $0x18] sm:$0xff] }
 0x129   : > { %v798_v19 = vpack.c.bf16 %v760_v17, %v758_v16 }
 0x12a   : > { %961 = vmatmul.bf16.gmra.mxu2 %v797_v18 }
 0x12b   : > { %1010 = vmatmul.bf16.gmra.mxu3 %v798_v19  ;;  %v677_v20 = vpop.f32.mrf.mxu0  ;;  %v777_v19 = vld [vmem:[#allocation2 + $0x50] sm:$0xff] }
 0x12c   : > { %v726_v21 = vpop.f32.mrf.mxu1  ;;  %v678_v22 = vadd.f32 %v677_v20, %v1878_v12 }
 0x12d   : > { %v727_v23 = vadd.f32 %v726_v21, %v1880_v13 }
 0x12e   : > { %v761_v28 = vmax.f32 %v678_v22, 0.0 }
 0x12f   : > { %v762_v30 = vmax.f32 %v727_v23, 0.0 }
 0x133   : > { %v679_v24 = vpop.f32.mrf.mxu0 }
 0x134   : > { %v680_v25 = vadd.f32 %v679_v24, %v1878_v12  ;;  %v728_v26 = vpop.f32.mrf.mxu1  ;;  %v778_v24 = vld [vmem:[#allocation2 + $0x68] sm:$0xff] }
 0x135   : > { %v729_v27 = vadd.f32 %v728_v26, %v1880_v13 }
 0x136   : > { %v763_v29 = vmax.f32 %v680_v25, 0.0 }
 0x137   : > { %v764_v31 = vmax.f32 %v729_v27, 0.0 }
 0x138   : > { %v799_v32 = vpack.c.bf16 %v763_v29, %v761_v28  ;;  %v779_v29 = vld [vmem:[#allocation2 + $0x8] sm:$0xff] }
 0x139   : > { %v800_v33 = vpack.c.bf16 %v764_v31, %v762_v30 }
 0x13a   : > { %966 = vmatmul.bf16.gmra.mxu2 %v799_v32 }
 0x13b   : > { %1015 = vmatmul.bf16.gmra.mxu3 %v800_v33  ;;  %v682_v34 = vpop.f32.mrf.mxu0 }
 0x13c   : > { %v731_v35 = vpop.f32.mrf.mxu1  ;;  %v683_v36 = vadd.f32 %v682_v34, %v1878_v12  ;;  %v780_v34 = vld [vmem:[#allocation2 + $0x48] sm:$0xff] }
 0x13d   : > { %v732_v37 = vadd.f32 %v731_v35, %v1880_v13 }
 0x13e   : > { %v765_v42 = vmax.f32 %v683_v36, 0.0 }
 0x13f   : > { %v766_v44 = vmax.f32 %v732_v37, 0.0 }
 0x143   : > { %v684_v38 = vpop.f32.mrf.mxu0 }
 0x144   : > { %v685_v39 = vadd.f32 %v684_v38, %v1878_v12  ;;  %v733_v40 = vpop.f32.mrf.mxu1 }
 0x145   : > { %v734_v41 = vadd.f32 %v733_v40, %v1880_v13 }
 0x146   : > { %v767_v43 = vmax.f32 %v685_v39, 0.0  ;;  %v781_v39 = vld [vmem:[#allocation2 + $0x40] sm:$0xff] }
 0x147   : > { %v768_v45 = vmax.f32 %v734_v41, 0.0 }
 0x148   : > { %v801_v46 = vpack.c.bf16 %v767_v43, %v765_v42 }
 0x149   : > { %v802_v47 = vpack.c.bf16 %v768_v45, %v766_v44  ;;  %v782_v44 = vld [vmem:[#allocation2 + $0x20] sm:$0xff] }
 0x14a   : > { %971 = vmatmul.bf16.gmra.mxu2 %v801_v46 }
 0x14b   : > { %1020 = vmatmul.bf16.gmra.mxu3 %v802_v47  ;;  %v687_v48 = vpop.f32.mrf.mxu0 }
 0x14c   : > { %v736_v49 = vpop.f32.mrf.mxu1  ;;  %v688_v50 = vadd.f32 %v687_v48, %v1878_v12 }
 0x14d   : > { %v737_v51 = vadd.f32 %v736_v49, %v1880_v13  ;;  %v783_v49 = vld [vmem:[#allocation2 + $0x10] sm:$0xff] }
 0x14e   : > { %v769_v56 = vmax.f32 %v688_v50, 0.0 }
 0x14f   : > { %v770_v58 = vmax.f32 %v737_v51, 0.0 }
 0x153   : > { %v689_v52 = vpop.f32.mrf.mxu0 }
 0x154   : > { %v690_v53 = vadd.f32 %v689_v52, %v1878_v12  ;;  %v738_v54 = vpop.f32.mrf.mxu1 }
 0x155   : > { %v739_v55 = vadd.f32 %v738_v54, %v1880_v13  ;;  %v784_v54 = vld [vmem:[#allocation2 + $0x38] sm:$0xff] }
 0x156   : > { %v771_v57 = vmax.f32 %v690_v53, 0.0 }
 0x157   : > { %v772_v59 = vmax.f32 %v739_v55, 0.0 }
 0x158   : > { %v803_v60 = vpack.c.bf16 %v771_v57, %v769_v56 }
 0x159   : > { %v804_v61 = vpack.c.bf16 %v772_v59, %v770_v58  ;;  %v785_v59 = vld [vmem:[#allocation2 + $0x60] sm:$0xff] }
 0x15a   : > { %976 = vmatmul.bf16.gmra.mxu2 %v803_v60 }
 0x15b   : > { %1025 = vmatmul.bf16.gmra.mxu3 %v804_v61 }
 0x16d   : > { %v942_v62 = vpop.f32.mrf.mxu2 }
 0x16e   : > { %v991_v0 = vpop.f32.mrf.mxu3 }
 0x16f   : > { %v992_v1 = vadd.f32 %v991_v0, %v942_v62  ;;  %v786_v0 = vld [vmem:[#allocation2 + $0x70] sm:$0xff] }
 0x171   : > { %v1031_v2 = vadd.f32 %v992_v1, %v773_v63 }
 0x173   : > { %1047 = vst [vmem:[#allocation2 + $0x30] sm:$0xff] %v1031_v2 }
 0x175   : > { %v944_v3 = vpop.f32.mrf.mxu2 }
 0x176   : > { %v993_v12 = vpop.f32.mrf.mxu3 }
 0x177   : > { %v994_v5 = vadd.f32 %v993_v12, %v944_v3  ;;  %v787_v12 = vld [vmem:[#allocation2 + $0x78] sm:$0xff] }
 0x179   : > { %v1032_v6 = vadd.f32 %v994_v5, %v774_v4 }
 0x17b   : > { %1048 = vst [vmem:[#allocation2] sm:$0xff] %v1032_v6 }
 0x17d   : > { %v947_v13 = vpop.f32.mrf.mxu2 }
 0x17e   : > { %v996_v8 = vpop.f32.mrf.mxu3 }
 0x17f   : > { %v997_v9 = vadd.f32 %v996_v8, %v947_v13  ;;  %v788_v8 = vld [vmem:[#allocation2 + $0x28] sm:$0xff] }
 0x181   : > { %v1033_v10 = vadd.f32 %v997_v9, %v775_v7 }
 0x183   : > { %1049 = vst [vmem:[#allocation2 + $0x58] sm:$0xff] %v1033_v10 }
 0x185   : > { %v949_v11 = vpop.f32.mrf.mxu2 }
 0x186   : > { %v998_v15 = vpop.f32.mrf.mxu3 }
 0x187   : > { %v999_v16 = vadd.f32 %v998_v15, %v949_v11 }
 0x189   : > { %v1034_v17 = vadd.f32 %v999_v16, %v776_v14 }
 0x18b   : > { %1050 = vst [vmem:[#allocation2 + $0x18] sm:$0xff] %v1034_v17 }
 0x18d   : > { %v952_v18 = vpop.f32.mrf.mxu2 }
 0x18e   : > { %v1001_v20 = vpop.f32.mrf.mxu3 }
 0x18f   : > { %v1002_v21 = vadd.f32 %v1001_v20, %v952_v18 }
 0x191   : > { %v1035_v22 = vadd.f32 %v1002_v21, %v777_v19 }
 0x193   : > { %1051 = vst [vmem:[#allocation2 + $0x50] sm:$0xff] %v1035_v22 }
 0x195   : > { %v954_v23 = vpop.f32.mrf.mxu2 }
 0x196   : > { %v1003_v25 = vpop.f32.mrf.mxu3 }
 0x197   : > { %v1004_v26 = vadd.f32 %v1003_v25, %v954_v23 }
 0x199   : > { %v1036_v27 = vadd.f32 %v1004_v26, %v778_v24 }
 0x19b   : > { %1052 = vst [vmem:[#allocation2 + $0x68] sm:$0xff] %v1036_v27 }
 0x19d   : > { %v957_v28 = vpop.f32.mrf.mxu2 }
 0x19e   : > { %v1006_v30 = vpop.f32.mrf.mxu3 }
 0x19f   : > { %v1007_v31 = vadd.f32 %v1006_v30, %v957_v28 }
 0x1a1   : > { %v1037_v32 = vadd.f32 %v1007_v31, %v779_v29 }
 0x1a3   : > { %1053 = vst [vmem:[#allocation2 + $0x8] sm:$0xff] %v1037_v32 }
 0x1a5   : > { %v959_v33 = vpop.f32.mrf.mxu2 }
 0x1a6   : > { %v1008_v35 = vpop.f32.mrf.mxu3 }
 0x1a7   : > { %v1009_v36 = vadd.f32 %v1008_v35, %v959_v33 }
 0x1a9   : > { %v1038_v37 = vadd.f32 %v1009_v36, %v780_v34 }
 0x1ab   : > { %1054 = vst [vmem:[#allocation2 + $0x48] sm:$0xff] %v1038_v37 }
 0x1ad   : > { %v962_v38 = vpop.f32.mrf.mxu2 }
 0x1ae   : > { %v1011_v40 = vpop.f32.mrf.mxu3 }
 0x1af   : > { %v1012_v41 = vadd.f32 %v1011_v40, %v962_v38 }
 0x1b1   : > { %v1039_v42 = vadd.f32 %v1012_v41, %v781_v39 }
 0x1b3   : > { %1055 = vst [vmem:[#allocation2 + $0x40] sm:$0xff] %v1039_v42 }
 0x1b5   : > { %v964_v43 = vpop.f32.mrf.mxu2 }
 0x1b6   : > { %v1013_v45 = vpop.f32.mrf.mxu3 }
 0x1b7   : > { %v1014_v46 = vadd.f32 %v1013_v45, %v964_v43 }
 0x1b9   : > { %v1040_v47 = vadd.f32 %v1014_v46, %v782_v44 }
 0x1bb   : > { %1056 = vst [vmem:[#allocation2 + $0x20] sm:$0xff] %v1040_v47 }
 0x1bd   : > { %v967_v48 = vpop.f32.mrf.mxu2 }
 0x1be   : > { %v1016_v50 = vpop.f32.mrf.mxu3 }
 0x1bf   : > { %v1017_v51 = vadd.f32 %v1016_v50, %v967_v48 }
 0x1c1   : > { %v1041_v52 = vadd.f32 %v1017_v51, %v783_v49 }
 0x1c3   : > { %1057 = vst [vmem:[#allocation2 + $0x10] sm:$0xff] %v1041_v52 }
 0x1c5   : > { %v969_v53 = vpop.f32.mrf.mxu2 }
 0x1c6   : > { %v1018_v55 = vpop.f32.mrf.mxu3 }
 0x1c7   : > { %v1019_v56 = vadd.f32 %v1018_v55, %v969_v53 }
 0x1c9   : > { %v1042_v57 = vadd.f32 %v1019_v56, %v784_v54 }
 0x1cb   : > { %1058 = vst [vmem:[#allocation2 + $0x38] sm:$0xff] %v1042_v57 }
 0x1cd   : > { %v972_v58 = vpop.f32.mrf.mxu2 }
 0x1ce   : > { %v1021_v60 = vpop.f32.mrf.mxu3 }
 0x1cf   : > { %v1022_v61 = vadd.f32 %v1021_v60, %v972_v58 }
 0x1d1   : > { %v1043_v62 = vadd.f32 %v1022_v61, %v785_v59 }
 0x1d3   : > { %1059 = vst [vmem:[#allocation2 + $0x60] sm:$0xff] %v1043_v62 }
 0x1d5   : > { %v974_v63 = vpop.f32.mrf.mxu2 }
 0x1d6   : > { %v1023_v1 = vpop.f32.mrf.mxu3 }
 0x1d7   : > { %v1024_v2 = vadd.f32 %v1023_v1, %v974_v63 }
 0x1d9   : > { %v1044_v3 = vadd.f32 %v1024_v2, %v786_v0 }
 0x1db   : > { %1060 = vst [vmem:[#allocation2 + $0x70] sm:$0xff] %v1044_v3 }
 0x1dd   : > { %v977_v4 = vpop.f32.mrf.mxu2 }
 0x1de   : > { %v1026_v5 = vpop.f32.mrf.mxu3 }
 0x1df   : > { %v1027_v6 = vadd.f32 %v1026_v5, %v977_v4 }
 0x1e1   : > { %v1045_v13 = vadd.f32 %v1027_v6, %v787_v12 }
 0x1e3   : > { %1061 = vst [vmem:[#allocation2 + $0x78] sm:$0xff] %v1045_v13 }
 0x1e5   : > { %v979_v7 = vpop.f32.mrf.mxu2 }
 0x1e6   : > { %v1028_v9 = vpop.f32.mrf.mxu3 }
 0x1e7   : > { %v1029_v10 = vadd.f32 %v1028_v9, %v979_v7 }
 0x1e9   : > { %v1046_v11 = vadd.f32 %v1029_v10, %v788_v8 }
 0x1eb   : > { %1062 = vst [vmem:[#allocation2 + $0x28] sm:$0xff] %v1046_v11 }
 0x1ec PF: > { %1064 = sbr.rel (!%p453_p9) target bundleno = 653 (0x28d), region = 56  ;;  %v1105_v14 = vld [vmem:[%s1784_s27 + $0x20] sm:$0xff] (%p453_p9)  ;;  %v1103_v15 = vld [vmem:[%s1784_s27 + $0x10] sm:$0xff] (%p453_p9)  ;;  %v1698_v17 = vmov (%p453_p9), 0   ;;  %v1106_v18 = vld [vmem:[%s1784_s27 + $0x28] sm:$0xff] (%p453_p9) }
 0x1ed   : > { %v1101_v16 = vld [vmem:[%s1784_s27] sm:$0xff] (%p453_p9)  ;;  %1643 = vset.pattern.permute.xlu2 (%p453_p9), %v1698_v17  ;;  %1642 = vset.pattern.permute.xlu1 (%p453_p9), %v1698_v17  ;;  %v1104_v19 = vld [vmem:[%s1784_s27 + $0x18] sm:$0xff] (%p453_p9)  ;;  %v1102_v20 = vld [vmem:[%s1784_s27 + $0x8] sm:$0xff] (%p453_p9) }
 0x1ee   : > { %1641 = vset.pattern.permute.xlu0 (%p453_p9), %v1698_v17  ;;  %1139 = vperm.xlu2 (%p453_p9), %1643, %v1105_v14   ;;  %v1109_v21 = vld [vmem:[%s1784_s27 + $0x40] sm:$0xff] (%p453_p9)  ;;  %v1108_v22 = vld [vmem:[%s1784_s27 + $0x38] sm:$0xff] (%p453_p9)  ;;  %v1107_v23 = vld [vmem:[%s1784_s27 + $0x30] sm:$0xff] (%p453_p9) }
 0x1ef   : > { %1129 = vperm.xlu1 (%p453_p9), %1642, %v1103_v15   ;;  %1119 = vperm.xlu0 (%p453_p9), %1641, %v1101_v16   ;;  %v1112_v24 = vld [vmem:[%s1784_s27 + $0x58] sm:$0xff] (%p453_p9)  ;;  %v1111_v25 = vld [vmem:[%s1784_s27 + $0x50] sm:$0xff] (%p453_p9)  ;;  %v1110_v26 = vld [vmem:[%s1784_s27 + $0x48] sm:$0xff] (%p453_p9) }
 0x1f0   : > { %v1115_v27 = vld [vmem:[%s1784_s27 + $0x70] sm:$0xff] (%p453_p9)  ;;  %v1114_v28 = vld [vmem:[%s1784_s27 + $0x68] sm:$0xff] (%p453_p9)  ;;  %v1113_v29 = vld [vmem:[%s1784_s27 + $0x60] sm:$0xff] (%p453_p9) }
 0x1f1   : > { %v1116_v30 = vld [vmem:[%s1784_s27 + $0x78] sm:$0xff]  ;;  %v1069_v31 = vld [vmem:[#allocation2 + $0x50] sm:$0xff]  ;;  %v1937_v32 = vld [vmem:[%s437_s30] ss:$0 sm:$0xff] }
 0x1f2   : > { %v1089_v33 = vadd.f32 %v1937_v32, %v1069_v31  ;;  %v1070_v36 = vld [vmem:[#allocation2 + $0x68] sm:$0xff]  ;;  %v1073_v40 = vld [vmem:[#allocation2 + $0x40] sm:$0xff]  ;;  %v1076_v44 = vld [vmem:[#allocation2 + $0x38] sm:$0xff] }
 0x1f3   : > { %v1090_v37 = vadd.f32 %v1937_v32, %v1070_v36  ;;  %v1093_v41 = vadd.f32 %v1937_v32, %v1073_v40  ;;  %v1067_v45 = vld [vmem:[#allocation2 + $0x58] sm:$0xff]  ;;  %v1065_v46 = vld [vmem:[#allocation2 + $0x30] sm:$0xff]  ;;  %v1096_v47 = vadd.f32 %v1937_v32, %v1076_v44  ;;  %v1066_v58 = vld [vmem:[#allocation2] sm:$0xff] }
 0x1f4   : > { %v1087_v48 = vadd.f32 %v1937_v32, %v1067_v45  ;;  %v1085_v49 = vadd.f32 %v1937_v32, %v1065_v46  ;;  %v1079_v56 = vld [vmem:[#allocation2 + $0x78] sm:$0xff]  ;;  %v1086_v61 = vadd.f32 %v1937_v32, %v1066_v58  ;;  %v1072_v4 = vld [vmem:[#allocation2 + $0x48] sm:$0xff]  ;;  %v1075_v10 = vld [vmem:[#allocation2 + $0x10] sm:$0xff] }
 0x1f5   : > { %v1068_v57 = vld [vmem:[#allocation2 + $0x18] sm:$0xff]  ;;  %v1099_v59 = vadd.f32 %v1937_v32, %v1079_v56  ;;  %v1071_v12 = vld [vmem:[#allocation2 + $0x8] sm:$0xff]  ;;  %v1092_v5 = vadd.f32 %v1937_v32, %v1072_v4  ;;  %v1074_v11 = vld [vmem:[#allocation2 + $0x20] sm:$0xff]  ;;  %v1095_v14 = vadd.f32 %v1937_v32, %v1075_v10 }
 0x1f6   : > { %1144 = vperm.xlu2 %1643, %v1106_v18   ;;  %v1088_v60 = vadd.f32 %v1937_v32, %v1068_v57  ;;  %v1091_v6 = vadd.f32 %v1937_v32, %v1071_v12  ;;  %v1094_v15 = vadd.f32 %v1937_v32, %v1074_v11 }
 0x1f7   : > { %1134 = vperm.xlu1 %1642, %v1104_v19   ;;  %1124 = vperm.xlu0 %1641, %v1102_v20   ;;  %v1078_v20 = vld [vmem:[#allocation2 + $0x70] sm:$0xff] }
 0x1fe   : > { %1159 = vperm.xlu2 %1643, %v1109_v21   ;;  %v1077_v21 = vld [vmem:[#allocation2 + $0x60] sm:$0xff] }
 0x1ff   : > { %1154 = vperm.xlu1 %1642, %v1108_v22   ;;  %1149 = vperm.xlu0 %1641, %v1107_v23   ;;  %v1098_v22 = vadd.f32 %v1937_v32, %v1078_v20  ;;  %v1097_v23 = vadd.f32 %v1937_v32, %v1077_v21 }
 0x206   : > { %1174 = vperm.xlu2 %1643, %v1112_v24  }
 0x207   : > { %1169 = vperm.xlu1 %1642, %v1111_v25   ;;  %1164 = vperm.xlu0 %1641, %v1110_v26  }
 0x20e   : > { %1189 = vperm.xlu2 %1643, %v1115_v27  }
 0x20f   : > { %1184 = vperm.xlu1 %1642, %v1114_v28   ;;  %1179 = vperm.xlu0 %1641, %v1113_v29   ;;  %v1080_v28 = vld [vmem:[#allocation2 + $0x28] sm:$0xff] }
 0x210   : > { %v1100_v29 = vadd.f32 %v1937_v32, %v1080_v28 }
 0x217   : > { %1194 = vperm.xlu0 %1641, %v1116_v30  }
 0x248   : > { %v1140_v34 = vpop.permute.xlu2 %1139 }
 0x249   : > { %v1201_v35 = vmul.f32 %v1140_v34, %v1089_v33 }
 0x24b   : > { %1217 = vst [vmem:[%s1801_s23 + $0x20] sm:$0xff] %v1201_v35 }
 0x250   : > { %v1145_v38 = vpop.permute.xlu2 %1144 }
 0x251   : > { %v1202_v39 = vmul.f32 %v1145_v38, %v1090_v37 }
 0x253   : > { %1218 = vst [vmem:[%s1801_s23 + $0x28] sm:$0xff] %v1202_v39 }
 0x258   : > { %v1160_v42 = vpop.permute.xlu2 %1159 }
 0x259   : > { %v1205_v43 = vmul.f32 %v1160_v42, %v1093_v41 }
 0x25b   : > { %1221 = vst [vmem:[%s1801_s23 + $0x40] sm:$0xff] %v1205_v43 }
 0x260   : > { %v1175_v50 = vpop.permute.xlu2 %1174 }
 0x261   : > { %v1208_v51 = vmul.f32 %v1175_v50, %v1096_v47  ;;  %v1130_v52 = vpop.permute.xlu1 %1129  ;;  %v1120_v53 = vpop.permute.xlu0 %1119 }
 0x262   : > { %v1199_v54 = vmul.f32 %v1130_v52, %v1087_v48  ;;  %v1197_v55 = vmul.f32 %v1120_v53, %v1085_v49 }
 0x263   : > { %1224 = vst [vmem:[%s1801_s23 + $0x58] sm:$0xff] %v1208_v51 }
 0x264   : > { %1215 = vst [vmem:[%s1801_s23 + $0x10] sm:$0xff] %v1199_v54 }
 0x265   : > { %1213 = vst [vmem:[%s1801_s23] sm:$0xff] %v1197_v55 }
 0x268   : > { %v1190_v62 = vpop.permute.xlu2 %1189 }
 0x269   : > { %v1211_v63 = vmul.f32 %v1190_v62, %v1099_v59  ;;  %v1135_v0 = vpop.permute.xlu1 %1134  ;;  %v1125_v1 = vpop.permute.xlu0 %1124 }
 0x26a   : > { %v1200_v2 = vmul.f32 %v1135_v0, %v1088_v60  ;;  %v1198_v3 = vmul.f32 %v1125_v1, %v1086_v61 }
 0x26b   : > { %1227 = vst [vmem:[%s1801_s23 + $0x70] sm:$0xff] %v1211_v63 }
 0x26c   : > { %1216 = vst [vmem:[%s1801_s23 + $0x18] sm:$0xff] %v1200_v2 }
 0x26d   : > { %1214 = vst [vmem:[%s1801_s23 + $0x8] sm:$0xff] %v1198_v3 }
 0x271   : > { %v1155_v13 = vpop.permute.xlu1 %1154  ;;  %v1150_v7 = vpop.permute.xlu0 %1149 }
 0x272   : > { %v1204_v8 = vmul.f32 %v1155_v13, %v1092_v5  ;;  %v1203_v9 = vmul.f32 %v1150_v7, %v1091_v6 }
 0x274   : > { %1220 = vst [vmem:[%s1801_s23 + $0x38] sm:$0xff] %v1204_v8 }
 0x275   : > { %1219 = vst [vmem:[%s1801_s23 + $0x30] sm:$0xff] %v1203_v9 }
 0x279   : > { %v1170_v16 = vpop.permute.xlu1 %1169  ;;  %v1165_v17 = vpop.permute.xlu0 %1164 }
 0x27a   : > { %v1207_v18 = vmul.f32 %v1170_v16, %v1095_v14  ;;  %v1206_v19 = vmul.f32 %v1165_v17, %v1094_v15 }
 0x27c   : > { %1223 = vst [vmem:[%s1801_s23 + $0x50] sm:$0xff] %v1207_v18 }
 0x27d   : > { %1222 = vst [vmem:[%s1801_s23 + $0x48] sm:$0xff] %v1206_v19 }
 0x281   : > { %v1185_v24 = vpop.permute.xlu1 %1184  ;;  %v1180_v25 = vpop.permute.xlu0 %1179 }
 0x282   : > { %v1210_v26 = vmul.f32 %v1185_v24, %v1098_v22  ;;  %v1209_v27 = vmul.f32 %v1180_v25, %v1097_v23 }
 0x284   : > { %1226 = vst [vmem:[%s1801_s23 + $0x68] sm:$0xff] %v1210_v26 }
 0x285   : > { %1225 = vst [vmem:[%s1801_s23 + $0x60] sm:$0xff] %v1209_v27 }
 0x289   : > { %v1195_v30 = vpop.permute.xlu0 %1194 }
 0x28a   : > { %v1212_v31 = vmul.f32 %v1195_v30, %v1100_v29 }
 0x28c   : > { %1228 = vst [vmem:[%s1801_s23 + $0x78] sm:$0xff] %v1212_v31 }
 0x28d PF: > { %1233 = sbr.rel (!%p1404_p10) target bundleno = 670 (0x29e), region = 60  ;;  %v1699_v33 = vmov (%p1404_p10), 0.0  }
 0x28e   : > { %1234 = vst [vmem:[%s1801_s23] sm:$0xff] (%p1404_p10), %v1699_v33 }
 0x28f   : > { %1235 = vst [vmem:[%s1801_s23 + $0x8] sm:$0xff] (%p1404_p10), %v1699_v33 }
 0x290   : > { %1236 = vst [vmem:[%s1801_s23 + $0x10] sm:$0xff] (%p1404_p10), %v1699_v33 }
 0x291   : > { %1237 = vst [vmem:[%s1801_s23 + $0x18] sm:$0xff] (%p1404_p10), %v1699_v33 }
 0x292   : > { %1238 = vst [vmem:[%s1801_s23 + $0x20] sm:$0xff] %v1699_v33 }
 0x293   : > { %1239 = vst [vmem:[%s1801_s23 + $0x28] sm:$0xff] %v1699_v33 }
 0x294   : > { %1240 = vst [vmem:[%s1801_s23 + $0x30] sm:$0xff] %v1699_v33 }
 0x295   : > { %1241 = vst [vmem:[%s1801_s23 + $0x38] sm:$0xff] %v1699_v33 }
 0x296   : > { %1242 = vst [vmem:[%s1801_s23 + $0x40] sm:$0xff] %v1699_v33 }
 0x297   : > { %1243 = vst [vmem:[%s1801_s23 + $0x48] sm:$0xff] %v1699_v33 }
 0x298   : > { %1244 = vst [vmem:[%s1801_s23 + $0x50] sm:$0xff] %v1699_v33 }
 0x299   : > { %1245 = vst [vmem:[%s1801_s23 + $0x58] sm:$0xff] %v1699_v33 }
 0x29a   : > { %1246 = vst [vmem:[%s1801_s23 + $0x60] sm:$0xff] %v1699_v33 }
 0x29b   : > { %1247 = vst [vmem:[%s1801_s23 + $0x68] sm:$0xff] %v1699_v33 }
 0x29c   : > { %1248 = vst [vmem:[%s1801_s23 + $0x70] sm:$0xff] %v1699_v33 }
 0x29d   : > { %1249 = vst [vmem:[%s1801_s23 + $0x78] sm:$0xff] %v1699_v33 }
 0x29e PF: > { %s31_s15 = sadd.s32 1, %s1693_s15   ;;  %s2007_s13 = smov %s1689_s14 }
 0x29f   : > { %p28_p11 = scmp.ge.s32.totalorder %s31_s15, 11   ;;  %s2008_s14 = smov %s2010_s0 }
 0x2a1   :  { %30 = sbr.rel (!%p28_p11) target bundleno = 9 (0x9), region = 105 }

</bundles_post_ra>
